<compile_context>
chip_gen: v7x
topology: tpu7x:2x2x1
jax: 0.10.0
libtpu: 0.0.40
codegen_flags: <defaults>
</compile_context>

<pallas_src>
import jax
import jax.numpy as jnp
from jax.experimental import pallas as pl
from jax.experimental.pallas import tpu as pltpu


# ----------------------------------------------------------------------------
# helpers
# ----------------------------------------------------------------------------
def _round_up(x, m):
    return (x + m - 1) // m * m


_TK_TARGET = 1024   # output-channel tile target (multiple of 16)
_TL_TARGET = 2048   # length tile target (multiple of 128)


# ----------------------------------------------------------------------------
# Pallas kernel: one fused (TK, Cp) @ (Cp, TL) matmul + f32 bias epilogue.
# ----------------------------------------------------------------------------
def _kp_fused_matmul_kernel(c_ref, w_ref, b_ref, o_ref):
    # c_ref: (1, Cp, TL) bf16 ; w_ref: (TK, Cp) bf16 ; b_ref: (TK, 1) f32
    # o_ref: (1, TK, TL) bf16  (accumulation is f32 inside the dot)
    acc = jnp.dot(w_ref[...], c_ref[0], preferred_element_type=jnp.float32)
    o_ref[0] = (acc + b_ref[...]).astype(o_ref.dtype)


def _run_pallas(c_pad, w_pad, b_pad, tk, tl, out_dtype=jnp.bfloat16):
    """c_pad: (B, Cp, Lp) bf16 ; w_pad: (Kp, Cp) bf16 ; b_pad: (Kp, 1) f32."""
    B, Cp, Lp = c_pad.shape
    Kp = w_pad.shape[0]
    n_kt = Kp // tk                      # Kp padded to a multiple of tk
    n_lt = pl.cdiv(Lp, tl)               # Lp is a multiple of 128
    grid = (B, n_kt, n_lt)

    out_bytes = jnp.dtype(out_dtype).itemsize
    flops = 2 * B * Kp * Cp * Lp
    bytes_accessed = (B * n_kt * Cp * Lp * 2       # c re-read once per K tile
                      + Kp * Cp * 2 + Kp * 4       # fused weight (bf16) + bias (f32)
                      + B * Kp * Lp * out_bytes)   # output writeback

    # Double-buffered working set + margin; keep within per-generation scoped
    # VMEM (v5e 16 MiB default / v6e,v7x 32 MiB default; v7x 64 MiB physical).
    vmem_bytes = (2 * tk * tl * out_bytes          # output double-buffer
                  + 2 * Cp * tl * 2                # c double-buffer
                  + 2 * tk * Cp * 2                # weight double-buffer
                  + 2 * tk * 4)                    # bias double-buffer
    vmem_limit = int(min(max(vmem_bytes + (8 << 20), 32 << 20), 48 << 20))

    return pl.pallas_call(
        _kp_fused_matmul_kernel,
        out_shape=jax.ShapeDtypeStruct((B, Kp, Lp), out_dtype),
        grid_spec=pltpu.PrefetchScalarGridSpec(
            num_scalar_prefetch=0,
            grid=grid,
            in_specs=[
                # c tile: per-batch, per-L-tile, all (padded) channels
                pl.BlockSpec((1, Cp, tl), lambda b, kt, lt: (b, 0, lt)),
                # weight tile: block index constant across inner L sweep -> resident
                pl.BlockSpec((tk, Cp), lambda b, kt, lt: (kt, 0)),
                # bias column: tiny, constant across inner L sweep
                pl.BlockSpec((tk, 1), lambda b, kt, lt: (kt, 0)),
            ],
            out_specs=pl.BlockSpec((1, tk, tl), lambda b, kt, lt: (b, kt, lt)),
        ),
        compiler_params=pltpu.CompilerParams(
            dimension_semantics=("parallel", "parallel", "parallel"),
            vmem_limit_bytes=vmem_limit),
        cost_estimate=pl.CostEstimate(flops=flops, transcendentals=0,
                                      bytes_accessed=int(bytes_accessed)),
    )(c_pad, w_pad, b_pad)


# ----------------------------------------------------------------------------
# KernelPredictor: weight-norm param setup + fused Pallas forward
# ----------------------------------------------------------------------------
class KernelPredictor:
    def __init__(self, cond_channels, conv_in_channels, conv_out_channels,
                 conv_layers, conv_kernel_size=3, *, key,
                 compute_dtype=jnp.bfloat16, output_dtype=jnp.float32):
        self.cond_channels = cond_channels
        self.conv_in_channels = conv_in_channels
        self.conv_out_channels = conv_out_channels
        self.conv_kernel_size = conv_kernel_size
        self.conv_layers = conv_layers
        self.compute_dtype = compute_dtype
        self.output_dtype = output_dtype

        kpnet_kernel_channels = (conv_in_channels * conv_out_channels
                                 * conv_kernel_size * conv_layers)
        kpnet_bias_channels = conv_out_channels * conv_layers
        self.kpnet_kernel_channels = kpnet_kernel_channels
        self.kpnet_bias_channels = kpnet_bias_channels

        k1, k2, k3, k4, k5, k6 = jax.random.split(key, 6)

        # Deterministic synthetic params.  weight_norm reparam: w = g * v/||v||
        # (norm over all dims except dim 0, PyTorch default for Conv1d k=1).
        def make_wn_conv1x1(kv, kg, kb, out_ch, in_ch):
            v = jax.random.normal(kv, (out_ch, in_ch), jnp.float32) * 0.1
            g = 1.0 + 0.01 * jax.random.normal(kg, (out_ch, 1), jnp.float32)
            bias = 0.01 * jax.random.normal(kb, (out_ch, 1), jnp.float32)
            norm = jnp.sqrt(jnp.sum(v * v, axis=1, keepdims=True))
            w = g * v / norm
            return w, bias

        self.w_kernel, self.b_kernel = make_wn_conv1x1(
            k1, k2, k3, kpnet_kernel_channels, cond_channels)
        self.w_bias, self.b_bias = make_wn_conv1x1(
            k4, k5, k6, kpnet_bias_channels, cond_channels)

        # --- fuse the two convs along the output-channel axis, pad for layout ---
        k_all = kpnet_kernel_channels + kpnet_bias_channels
        k16 = _round_up(k_all, 16)                 # bf16 sublane packing
        self.tk = min(k16, _TK_TARGET)
        self.k_all_padded = _round_up(k16, self.tk)  # no ragged / masked K tile
        self.c_padded = _round_up(cond_channels, 16)

        w_all = jnp.concatenate([self.w_kernel, self.w_bias], axis=0)   # (Kall, C)
        b_all = jnp.concatenate([self.b_kernel, self.b_bias], axis=0)   # (Kall, 1)
        w_pad = jnp.pad(w_all, ((0, self.k_all_padded - k_all),
                                (0, self.c_padded - cond_channels)))
        b_pad = jnp.pad(b_all, ((0, self.k_all_padded - k_all), (0, 0)))
        self.w_pad = w_pad.astype(compute_dtype)    # (Kp, Cp) bf16
        self.b_pad = b_pad                          # (Kp, 1)  f32 (exact bias add)

    def __call__(self, c):
        """c: (batch, cond_channels, cond_length) -> (kernels, bias)."""
        batch, C, cond_length = c.shape

        # Pad channels to Cp (sublane packing) and length to a multiple of 128
        # (lane-dense stores).  Zero padding is numerically free.
        Lp = _round_up(cond_length, 128)
        tl = min(Lp, _TL_TARGET)
        c_pad = jnp.pad(c, ((0, 0), (0, self.c_padded - C),
                            (0, Lp - cond_length))).astype(self.compute_dtype)

        out = _run_pallas(c_pad, self.w_pad, self.b_pad, self.tk, tl,
                          out_dtype=self.compute_dtype)   # (B, Kp, Lp) bf16

        kch = self.kpnet_kernel_channels
        bch = self.kpnet_bias_channels
        # Slice off padding; cast back to the requested output dtype (fused
        # with the slice copy by XLA).
        k = out[:, :kch, :cond_length].astype(self.output_dtype)
        b = out[:, kch:kch + bch, :cond_length].astype(self.output_dtype)
        kernels = k.reshape(batch, self.conv_layers, self.conv_in_channels,
                            self.conv_out_channels, self.conv_kernel_size,
                            cond_length)
        bias = b.reshape(batch, self.conv_layers, self.conv_out_channels,
                         cond_length)
        return kernels, bias


# ----------------------------------------------------------------------------
# main
# ----------------------------------------------------------------------------
if __name__ == "__main__":
    key = jax.random.PRNGKey(0)
    k_params, k_input = jax.random.split(key)

    # Small shapes consistent with the module.
    batch = 2
    cond_channels = 4
    conv_in_channels = 4
    conv_out_channels = 4
    conv_layers = 3
    conv_kernel_size = 3
    cond_length = 16

    model = KernelPredictor(cond_channels, conv_in_channels, conv_out_channels,
                            conv_layers, conv_kernel_size, key=k_params)

    c = jax.random.normal(k_input, (batch, cond_channels, cond_length),
                          jnp.float32)

    kernels, bias = model(c)
    jax.block_until_ready((kernels, bias))

    # Reference: plain-JAX 1x1 convs with bf16-rounded inputs/weights and an
    # exact f32 bias add (matches the kernel's bf16-in / f32-accumulate math).
    bf = lambda x: x.astype(jnp.bfloat16).astype(jnp.float32)
    hp = jax.lax.Precision.HIGHEST
    k_ref = (jnp.einsum("oc,bcl->bol", bf(model.w_kernel), bf(c), precision=hp)
             + model.b_kernel[None])
    b_ref = (jnp.einsum("oc,bcl->bol", bf(model.w_bias), bf(c), precision=hp)
             + model.b_bias[None])
    kernels_ref = k_ref.reshape(batch, conv_layers, conv_in_channels,
                                conv_out_channels, conv_kernel_size, cond_length)
    bias_ref = b_ref.reshape(batch, conv_layers, conv_out_channels, cond_length)

    assert kernels.shape == (batch, conv_layers, conv_in_channels,
                             conv_out_channels, conv_kernel_size, cond_length)
    assert bias.shape == (batch, conv_layers, conv_out_channels, cond_length)
    assert kernels.dtype == jnp.float32 and bias.dtype == jnp.float32
    # Output is stored as bf16 in the kernel (perf), so tolerances cover one
    # bf16 rounding of the final value.
    assert jnp.allclose(kernels, kernels_ref, atol=2e-2, rtol=2e-2)
    assert jnp.allclose(bias, bias_ref, atol=2e-2, rtol=2e-2)

    # Sanity vs. full-f32 math (loose: bf16 operand + output rounding).
    k_f32 = (jnp.einsum("oc,bcl->bol", model.w_kernel, c, precision=hp)
             + model.b_kernel[None])
    assert jnp.allclose(kernels.reshape(batch, -1, cond_length), k_f32,
                        atol=5e-2, rtol=5e-2)

    print("KERNEL_OK")
</pallas_src>

<mosaic_0001>
module attributes {stable_mosaic.version = 11 : i64} {
  func.func @_kp_fused_matmul_kernel(%arg0: i32, %arg1: i32, %arg2: i32, %arg3: memref<1x16x128xbf16, #tpu.memory_space<vmem>>, %arg4: memref<160x16xbf16, #tpu.memory_space<vmem>>, %arg5: memref<160x1xf32, #tpu.memory_space<vmem>>, %arg6: memref<1x160x128xbf16, #tpu.memory_space<vmem>>) attributes {dimension_semantics = [#tpu.dimension_semantics<parallel>, #tpu.dimension_semantics<parallel>, #tpu.dimension_semantics<parallel>], iteration_bounds = array<i64: 2, 1, 1>, scalar_prefetch = 0 : i64, scratch_operands = 0 : i64, tpu.core_type = #tpu.core_type<tc>, window_params = [{transform_indices = @transform_0, window_bounds = array<i64: 1, 16, 128>}, {transform_indices = @transform_1, window_bounds = array<i64: 160, 16>}, {transform_indices = @transform_2, window_bounds = array<i64: 160, 1>}, {transform_indices = @transform_3, window_bounds = array<i64: 1, 160, 128>}]} {
    %c0 = arith.constant 0 : index
    %c0_0 = arith.constant 0 : index
    %0 = vector.load %arg4[%c0, %c0_0] : memref<160x16xbf16, #tpu.memory_space<vmem>>, vector<160x16xbf16>
    %c0_1 = arith.constant 0 : index
    %c0_2 = arith.constant 0 : index
    %c0_3 = arith.constant 0 : index
    %1 = vector.load %arg3[%c0_1, %c0_2, %c0_3] : memref<1x16x128xbf16, #tpu.memory_space<vmem>>, vector<1x16x128xbf16>
    %2 = vector.shape_cast %1 : vector<1x16x128xbf16> to vector<16x128xbf16>
    %cst = arith.constant dense<0.000000e+00> : vector<160x128xf32>
    %3 = tpu.matmul %0, %2, %cst {dimension_numbers = #tpu.dot_dimension_numbers<[1], [0], [0], [1], [0, 0, 1, 1], [], []>} : vector<160x16xbf16>, vector<16x128xbf16>, vector<160x128xf32> -> vector<160x128xf32>
    %c0_4 = arith.constant 0 : index
    %c0_5 = arith.constant 0 : index
    %4 = vector.load %arg5[%c0_4, %c0_5] : memref<160x1xf32, #tpu.memory_space<vmem>>, vector<160x1xf32>
    %5 = vector.broadcast %4 : vector<160x1xf32> to vector<160x128xf32>
    %6 = arith.addf %3, %5 : vector<160x128xf32>
    %7 = arith.truncf %6 : vector<160x128xf32> to vector<160x128xbf16>
    %c0_6 = arith.constant 0 : index
    %c0_7 = arith.constant 0 : index
    %c0_8 = arith.constant 0 : index
    %8 = vector.load %arg6[%c0_6, %c0_7, %c0_8] : memref<1x160x128xbf16, #tpu.memory_space<vmem>>, vector<1x160x128xbf16>
    %9 = vector.shape_cast %8 : vector<1x160x128xbf16> to vector<160x128xbf16>
    %10 = vector.shape_cast %7 : vector<160x128xbf16> to vector<1x160x128xbf16>
    tpu.vector_store %arg6[%c0_6, %c0_7, %c0_8], %10 {strides = array<i32>} : memref<1x160x128xbf16, #tpu.memory_space<vmem>>, vector<1x160x128xbf16>,
    return
  }
  func.func @transform_0(%arg0: i32, %arg1: i32, %arg2: i32) -> (i32, i32, i32) {
    %c0_i32 = arith.constant 0 : i32
    %c0_i32_0 = arith.constant 0 : i32
    return %arg0, %c0_i32, %arg2 : i32, i32, i32
  }
  func.func @transform_1(%arg0: i32, %arg1: i32, %arg2: i32) -> (i32, i32) {
    %c0_i32 = arith.constant 0 : i32
    %c0_i32_0 = arith.constant 0 : i32
    return %arg1, %c0_i32 : i32, i32
  }
  func.func @transform_2(%arg0: i32, %arg1: i32, %arg2: i32) -> (i32, i32) {
    %c0_i32 = arith.constant 0 : i32
    %c0_i32_0 = arith.constant 0 : i32
    return %arg1, %c0_i32 : i32, i32
  }
  func.func @transform_3(%arg0: i32, %arg1: i32, %arg2: i32) -> (i32, i32, i32) {
    %c0_i32 = arith.constant 0 : i32
    return %arg0, %arg1, %arg2 : i32, i32, i32
  }
}

</mosaic_0001>

<bundles_post_ra>
// kernel: tpu_custom_call.1
= control target key start
LH: loop header
LB: loop body
LE: loop exit
PB: predicated region body
PF: predicated region fallthrough
CT: control target
= control target key end

     0   :  { %8 = vsyncpa [#allocation3], 0  ;;  %s1410_s0 = inlined_call_operand.vmem [shape: bf16[2,16,128], index: 0, kind: input, shape index: {}]   ;;  %s1411_s1 = inlined_call_operand.vmem [shape: bf16[160,16], index: 1, kind: input, shape index: {}]   ;;  %s1412_s2 = inlined_call_operand.vmem [shape: f32[160,1], index: 2, kind: input, shape index: {}]   ;;  %s1413_s3 = inlined_call_operand.hbm [shape: bf16[2,160,128], index: 3, kind: output, shape index: {}]  }
   0x1   :  { %10 = vsyncpa [#allocation3 + $0x1], 0  ;;  %s1166_s12 = smov 0   ;;  %s1168_s13 = smov 0  }
   0x2   :  { %s1170_s14 = smov 0   ;;  %s1172_s15 = smov 0  }
   0x3   :  { %s1174_s16 = smov 0   ;;  %s1176_s17 = smov 0  }
   0x4 LB: > { %s821_s18 = sadd.s32 4294967295, %s1140_s17   ;;  %s822_s19 = sadd.s32 4294967294, %s1140_s17   ;;  %s1140_s17 = sphi %s1176_s17, %s16_s17   ;;  %s1136_s16 = sphi %s1174_s16, %s1420_s16   ;;  %s1132_s15 = sphi %s1172_s15, %s1419_s15   ;;  %s1128_s14 = sphi %s1170_s14, %s1418_s14   ;;  %s1124_s13 = sphi %s1168_s13, %s1417_s13   ;;  %s1120_s12 = sphi %s1166_s12, %s1416_s12  }
   0x5   : > { %s35_s20 = sadd.s32 1, %s1136_s16  ;;  %s126_s21 = sadd.s32 1, %s1128_s14 }
   0x6   : > { %p37_p0 = scmp.ge.s32.totalorder %s35_s20, 2  ;;  %p136_p1 = scmp.ne.s32.totalorder %s1128_s14, %s1124_s13 }
   0x7   : > { %p137_p2 = scmp.eq.s32.totalorder %s821_s18, 1  ;;  %p142_p3 = scmp.ne.s32.totalorder %s1124_s13, %s1120_s12 }
   0x8   : > { %s1422_s20 = smov (%p37_p0, %s35_s20), 0  ;;  %p143_p5 = scmp.eq.s32.totalorder %s822_s19, 1 }
   0x9   : > { %p1206_p4 = por %p137_p2, %p136_p1  ;;  %s119_s23 = ssub.s32 %s1136_s16, %s1422_s20 }
   0xa   : > { %p827_p6 = scmp.ge.s32.totalorder %s1140_s17, 1  ;;  %p124_p7 = scmp.eq.s32.totalorder %s119_s23, 0 }
   0xb   : > { %p1213_p8 = por %p143_p5, %p142_p3  ;;  %p190_p9 = scmp.lt.s32.totalorder %s1140_s17, 3 }
   0xc   : > { %s1219_s25 = scalar_select %p124_p7, %s1128_s14, %s126_s21  }
   0xd   : > { %p191_p10 = pnand %p827_p6, %p190_p9 }
   0xe   : > { %p227_p11 = scmp.lt.s32.totalorder (!%p191_p10), %s1132_s15, 1  ;;  %v1052_v0 = vld [vmem:[%s1411_s1] sm:$0xff] (!%p191_p10)   ;;  %vm447_vm0 = vcmask (!%p191_p10), 130048   ;;  %v1053_v1 = vld [vmem:[%s1411_s1 + $0x30] sm:$0xff] (!%p191_p10)   ;;  %v1142_v2 = vmov (!%p191_p10), 0   ;;  %v1054_v4 = vld [vmem:[%s1411_s1 + $0x8] sm:$0xff] (!%p191_p10)  }
   0xf   : > { %194 = sbr.rel (%p191_p10) target bundleno = 281 (0x119), region = 32  ;;  %967 = vmatprep.mubr.msk.bf16.mxu0 (!%p191_p10), %vm447_vm0, %v1052_v0  ;;  %979 = vmatprep.mubr.msk.bf16.mxu1 (!%p191_p10), %vm447_vm0, %v1053_v1  ;;  %v1055_v5 = vld [vmem:[%s1411_s1 + $0x38] sm:$0xff] (!%p191_p10)   ;;  %v1056_v6 = vld [vmem:[%s1411_s1 + $0x10] sm:$0xff] (!%p191_p10)   ;;  %v1057_v7 = vld [vmem:[%s1411_s1 + $0x40] sm:$0xff] (!%p191_p10)   ;;  %s224_s19 = sand.u32 (!%p191_p10), 1, %s1124_s13  }
  0x10   : > { %1050 = vset.pattern.permute.xlu1 (!%p191_p10), %v1142_v2  ;;  %1049 = vset.pattern.permute.xlu0 (!%p191_p10), %v1142_v2  ;;  %v273_v8 = vld [vmem:[%s1412_s2 + $0x10] sm:$0xff] (!%p191_p10)  ;;  %v271_v9 = vld [vmem:[%s1412_s2] sm:$0xff] (!%p191_p10)  ;;  %v274_v10 = vld [vmem:[%s1412_s2 + $0x18] sm:$0xff] (!%p191_p10)  ;;  %s989_s21 = smul.u32 (!%p191_p10), 80, %s224_s19  ;;  %s1143_s5 = smov (!%p191_p10), [#allocation2]  }
  0x11   : > { %303 = vperm.xlu1 (!%p191_p10), %1050, %v273_v8   ;;  %293 = vperm.xlu0 (!%p191_p10), %1049, %v271_v9   ;;  %v272_v11 = vld [vmem:[%s1412_s2 + $0x8] sm:$0xff] (!%p191_p10)  ;;  %v1058_v12 = vld [vmem:[%s1411_s1 + $0x18] sm:$0xff] (!%p191_p10)   ;;  %v1060_v14 = vld [vmem:[%s1411_s1 + $0x20] sm:$0xff] (!%p191_p10)   ;;  %s990_s26 = smul.u32 (!%p191_p10), 1280, %s1132_s15  ;;  %s1066_s6 = sshll.u32 (!%p191_p10), %s1143_s5, 4  ;;  %s1067_s6 = int_to_ptr.vmem [resolvable:$false] %s1066_s6 }
  0x12   : > { %v1059_v13 = vld [vmem:[%s1411_s1 + $0x48] sm:$0xff] (!%p191_p10)   ;;  %v275_v16 = vld [vmem:[%s1412_s2 + $0x20] sm:$0xff] (!%p191_p10)  ;;  %v278_v17 = vld [vmem:[%s1412_s2 + $0x38] sm:$0xff] (!%p191_p10)  ;;  %s1337_s23 = scalar_lea.vmem (!%p191_p10), [#allocation2], %s989_s21 }
  0x13   : > { %v276_v15 = vld [vmem:[%s1412_s2 + $0x28] sm:$0xff] (!%p191_p10)  ;;  %v277_v18 = vld [vmem:[%s1412_s2 + $0x30] sm:$0xff] (!%p191_p10)  ;;  %v279_v21 = vld [vmem:[%s1412_s2 + $0x40] sm:$0xff] (!%p191_p10)  ;;  %s708_s27 = sshll.u32 (!%p191_p10), %s1337_s23, 4  ;;  %s1358_s27 = int_to_ptr.vmem [resolvable:$true] %s708_s27 }
  0x14   : > { %v1061_v19 = vld [vmem:[%s1411_s1 + $0x28] sm:$0xff] (!%p191_p10)   ;;  %v282_v22 = vld [vmem:[%s1412_s2 + $0x58] sm:$0xff] (!%p191_p10)  ;;  %v281_v23 = vld [vmem:[%s1412_s2 + $0x50] sm:$0xff] (!%p191_p10)  ;;  %p1069_p1 = scmp.lt.s32.totalorder (!%p191_p10), %s1358_s27, %s1067_s6 }
  0x15   : > { %308 = vperm.xlu1 (!%p191_p10), %1050, %v274_v10   ;;  %298 = vperm.xlu0 (!%p191_p10), %1049, %v272_v11   ;;  %v280_v20 = vld [vmem:[%s1412_s2 + $0x48] sm:$0xff] (!%p191_p10)  ;;  %v283_v25 = vld [vmem:[%s1412_s2 + $0x60] sm:$0xff] (!%p191_p10)  ;;  %v286_v26 = vld [vmem:[%s1412_s2 + $0x78] sm:$0xff] (!%p191_p10) }
  0x16   : > { %s228_s30 = scalar_select %p227_p11, %s1132_s15, 1  ;;  %v284_v24 = vld [vmem:[%s1412_s2 + $0x68] sm:$0xff]  ;;  %v285_v27 = vld [vmem:[%s1412_s2 + $0x70] sm:$0xff]  ;;  %v287_v29 = vld [vmem:[%s1412_s2 + $0x80] sm:$0xff] }
  0x17   : > { %v288_v28 = vld [vmem:[%s1412_s2 + $0x88] sm:$0xff]  ;;  %v290_v30 = vld [vmem:[%s1412_s2 + $0x98] sm:$0xff]  ;;  %v289_v31 = vld [vmem:[%s1412_s2 + $0x90] sm:$0xff]  ;;  %s1364_s15 = scalar_lea.sflag [#allocation3], %s224_s19 }
  0x18   : > { %s874_s4 = sshll.u32 %s228_s30, 3  ;;  %s1356_s30 = scalar_lea.hbm %s1413_s3, %s990_s26 }
  0x19   : > { %s234_s7 = scalar_lea.vmem %s1410_s0, %s874_s4  ;;  %318 = vperm.xlu1 %1050, %v276_v15   ;;  %313 = vperm.xlu0 %1049, %v275_v16   ;;  %s1062_s4 = scalar_lea.vmem %s1358_s27, 1280 }
  0x1a   : > { %v1051_v3 = vld [vmem:[%s234_s7] sm:$0xff]   ;;  %p1063_p12 = scmp.ne.s32.totalorder %s1358_s27, %s1062_s4  ;;  %s1068_s7 = scalar_lea.vmem %s1067_s6, 2560 }
  0x1b   : > { %965 = vmatprep.subr.bf16.mxu0 %v1051_v3  ;;  %987 = vmatprep.subr.bf16.mxu1 %v1051_v3  ;;  %p1070_p2 = scmp.lt.s32.totalorder %s1068_s7, %s1062_s4 }
  0x1c   : > { %966 = vmatpush3.bf16.msra.mxu0 %v1051_v3  ;;  %988 = vmatpush3.bf16.msra.mxu1 %v1051_v3  ;;  %p1064_p13 = pnand %p1063_p12, %p1206_p4 }
  0x1d   : > { %328 = vperm.xlu1 %1050, %v278_v17   ;;  %323 = vperm.xlu0 %1049, %v277_v18   ;;  %p1071_p3 = por %p1070_p2, %p1069_p1 }
  0x1e   : > { %p1065_p0 = pneg %p1064_p13 }
  0x1f   : > { %968 = vmatmul.mubr.msk.bf16.vlgmr.msra.gmra.mrb[0].mxu0 %vm447_vm0, %v1054_v4  ;;  %980 = vmatmul.mubr.msk.bf16.vlgmr.msra.gmra.mrb[0].mxu1 %vm447_vm0, %v1055_v5 }
  0x20   : > { %971 = vmatprep.mubr.msk.bf16.mxu0 %vm447_vm0, %v1056_v6  ;;  %983 = vmatprep.mubr.msk.bf16.mxu1 %vm447_vm0, %v1057_v7  ;;  %p1072_p5 = pnand %p1071_p3, %p1065_p0 }
  0x21   : > { %338 = vperm.xlu1 %1050, %v280_v20   ;;  %333 = vperm.xlu0 %1049, %v279_v21  }
  0x25   : > { %348 = vperm.xlu1 %1050, %v282_v22   ;;  %343 = vperm.xlu0 %1049, %v281_v23  }
  0x27   : > { %972 = vmatmul.mubr.msk.bf16.gmra.mrb[4].mxu0 %vm447_vm0, %v1058_v12  ;;  %984 = vmatmul.mubr.msk.bf16.gmra.mrb[4].mxu1 %vm447_vm0, %v1059_v13 }
  0x28   : > { %975 = vmatprep.mubr.msk.bf16.mxu0 %vm447_vm0, %v1060_v14 }
  0x29   : > { %358 = vperm.xlu1 %1050, %v284_v24   ;;  %353 = vperm.xlu0 %1049, %v283_v25  }
  0x2d   : > { %368 = vperm.xlu1 %1050, %v286_v26   ;;  %363 = vperm.xlu0 %1049, %v285_v27  }
  0x2f   : > { %976 = vmatmul.mubr.msk.bf16.gmra.mrb[8].mxu0 %vm447_vm0, %v1061_v19 }
  0x31   : > { %378 = vperm.xlu1 %1050, %v288_v28   ;;  %373 = vperm.xlu0 %1049, %v287_v29  }
  0x35   : > { %388 = vperm.xlu1 %1050, %v290_v30   ;;  %383 = vperm.xlu0 %1049, %v289_v31  }
  0x90   : > { %v304_v32 = vpop.permute.xlu1 %303  ;;  %v294_v33 = vpop.permute.xlu0 %293 }
  0x94   : > { %v309_v34 = vpop.permute.xlu1 %308  ;;  %v299_v35 = vpop.permute.xlu0 %298 }
  0x98   : > { %v319_v36 = vpop.permute.xlu1 %318  ;;  %v314_v37 = vpop.permute.xlu0 %313 }
  0x9c   : > { %v329_v38 = vpop.permute.xlu1 %328  ;;  %v324_v39 = vpop.permute.xlu0 %323 }
  0xa0   : > { %v1326_v40 = vpop.permute.xlu1 %338  ;;  %v1328_v41 = vpop.permute.xlu0 %333 }
  0xa4   : > { %v1330_v42 = vpop.permute.xlu1 %348  ;;  %v1332_v43 = vpop.permute.xlu0 %343 }
  0xa8   : > { %v359_v44 = vpop.permute.xlu1 %358  ;;  %v354_v45 = vpop.permute.xlu0 %353 }
  0xac   : > { %v369_v46 = vpop.permute.xlu1 %368  ;;  %v364_v47 = vpop.permute.xlu0 %363 }
  0xb0   : > { %v379_v48 = vpop.permute.xlu1 %378  ;;  %v374_v49 = vpop.permute.xlu0 %373 }
  0xb4   : > { %v389_v6 = vpop.permute.xlu1 %388  ;;  %v384_v7 = vpop.permute.xlu0 %383 }
  0xf2   : > { %v969_v50 = vpop.f32.mrb[0].mxu0  ;;  %v981_v51 = vpop.f32.mrb[0].mxu1 }
  0xf3   : > { %v512_v52 = vpop.f32.mrb[1].mxu0  ;;  %v560_v53 = vpop.f32.mrb[1].mxu1  ;;  %v521_v56 = vadd.f32 %v969_v50, %v304_v32  ;;  %v569_v57 = vadd.f32 %v981_v51, %v364_v47 }
  0xf4   : > { %v970_v54 = vpop.f32.mrb[2].mxu0  ;;  %v982_v55 = vpop.f32.mrb[2].mxu1  ;;  %v513_v62 = vadd.f32 %v512_v52, %v294_v33  ;;  %v561_v63 = vadd.f32 %v560_v53, %v354_v45 }
  0xf5   : > { %v524_v58 = vadd.f32 %v970_v54, %v309_v34  ;;  %v572_v59 = vadd.f32 %v982_v55, %v369_v46  ;;  %v515_v60 = vpop.f32.mrb[3].mxu0  ;;  %v563_v61 = vpop.f32.mrb[3].mxu1 }
  0xf6   : > { %v516_v0 = vadd.f32 %v515_v60, %v299_v35  ;;  %v564_v1 = vadd.f32 %v563_v61, %v359_v44 }
  0xf7   : > { %v903_v2 = vpack.c.bf16 %v524_v58, %v521_v56  ;;  %v933_v3 = vpack.c.bf16 %v572_v59, %v569_v57 }
  0xf8   : > { %v898_v4 = vpack.c.bf16 %v516_v0, %v513_v62  ;;  %v928_v5 = vpack.c.bf16 %v564_v1, %v561_v63 }
  0xf9   : > { %945 = vst [vmem:[%s1337_s23 + $0x8] sm:$0xff] %v903_v2   ;;  %951 = vst [vmem:[%s1337_s23 + $0x38] sm:$0xff] %v933_v3  }
  0xfa   : > { %899 = vst [vmem:[%s1337_s23] sm:$0xff] %v898_v4   ;;  %950 = vst [vmem:[%s1337_s23 + $0x30] sm:$0xff] %v928_v5   ;;  %v973_v8 = vpop.f32.mrb[4].mxu0  ;;  %v985_v9 = vpop.f32.mrb[4].mxu1 }
  0xfb   : > { %v528_v10 = vpop.f32.mrb[5].mxu0  ;;  %v576_v11 = vpop.f32.mrb[5].mxu1  ;;  %v537_v14 = vadd.f32 %v973_v8, %v324_v39  ;;  %v585_v15 = vadd.f32 %v985_v9, %v384_v7 }
  0xfc   : > { %v974_v12 = vpop.f32.mrb[6].mxu0  ;;  %v986_v13 = vpop.f32.mrb[6].mxu1  ;;  %v529_v20 = vadd.f32 %v528_v10, %v314_v37  ;;  %v577_v21 = vadd.f32 %v576_v11, %v374_v49 }
  0xfd   : > { %v540_v16 = vadd.f32 %v974_v12, %v329_v38  ;;  %v588_v17 = vadd.f32 %v986_v13, %v389_v6  ;;  %v531_v18 = vpop.f32.mrb[7].mxu0  ;;  %v579_v19 = vpop.f32.mrb[7].mxu1 }
  0xfe   : > { %v532_v22 = vadd.f32 %v531_v18, %v319_v36  ;;  %v580_v23 = vadd.f32 %v579_v19, %v379_v48 }
  0xff   : > { %v913_v24 = vpack.c.bf16 %v540_v16, %v537_v14  ;;  %v943_v25 = vpack.c.bf16 %v588_v17, %v585_v15 }
 0x100   : > { %v908_v26 = vpack.c.bf16 %v532_v22, %v529_v20  ;;  %v938_v27 = vpack.c.bf16 %v580_v23, %v577_v21 }
 0x101   : > { %947 = vst [vmem:[%s1337_s23 + $0x18] sm:$0xff] %v913_v24   ;;  %953 = vst [vmem:[%s1337_s23 + $0x48] sm:$0xff] %v943_v25  }
 0x102   : > { %946 = vst [vmem:[%s1337_s23 + $0x10] sm:$0xff] %v908_v26   ;;  %952 = vst [vmem:[%s1337_s23 + $0x40] sm:$0xff] %v938_v27   ;;  %v977_v28 = vpop.f32.mrb[8].mxu0 }
 0x103   : > { %v544_v29 = vpop.f32.mrb[9].mxu0  ;;  %v553_v31 = vadd.f32 %v977_v28, %v1332_v43 }
 0x104   : > { %v978_v30 = vpop.f32.mrb[10].mxu0  ;;  %v545_v34 = vadd.f32 %v544_v29, %v1328_v41 }
 0x105   : > { %v556_v32 = vadd.f32 %v978_v30, %v1330_v42  ;;  %v547_v33 = vpop.f32.mrb[11].mxu0 }
 0x106   : > { %v548_v35 = vadd.f32 %v547_v33, %v1326_v40 }
 0x107   : > { %v923_v36 = vpack.c.bf16 %v556_v32, %v553_v31 }
 0x108   : > { %v918_v37 = vpack.c.bf16 %v548_v35, %v545_v34 }
 0x109   : > { %949 = vst [vmem:[%s1337_s23 + $0x28] sm:$0xff] %v923_v36  }
 0x10a   : > { %948 = vst [vmem:[%s1337_s23 + $0x20] sm:$0xff] %v918_v37  }
 0x10b   : > { %1075 = shalt.err (!%p1072_p5)
}
 0x10c   : > { %s1076_s8 = scalar_lea.hbm %s1356_s30, 1280  ;;  %s1080_s11 = scalar_lea.hbm %s1413_s3, 2560 }
 0x10d   : > { %p1077_p6 = scmp.ne.s32.totalorder %s1356_s30, %s1076_s8  ;;  %p1081_p10 = scmp.lt.u32.totalorder %s1356_s30, %s1413_s3 }
 0x10e   : > { %p1082_p11 = scmp.lt.u32.totalorder %s1080_s11, %s1076_s8  ;;  %p1084_p13 = scmp.lt.u32.totalorder %s1076_s8, %s1356_s30 }
 0x10f   : > { %p1078_p7 = pnand %p1077_p6, %p1206_p4 }
 0x110   : > { %p1083_p12 = por %p1082_p11, %p1081_p10 }
 0x111   : > { %p1079_p9 = pneg %p1078_p7 }
 0x112   : > { %p1085_p0 = por %p1084_p13, %p1083_p12 }
 0x114   : > { %p1086_p1 = pnand %p1085_p0, %p1079_p9 }
 0x116   : > { %1089 = shalt.err (!%p1086_p1)
}
 0x117   : > { %s1144_s21 = smov 64   ;;  %s1145_s23 = smov 4  }
 0x118   : > { %991 = dma.vmem_to_hbm [thread:$0]  (%p1206_p4), %s1358_s27, 1280, %s1356_s30, %s1364_s15, %s1144_s21, %s1144_s21, %s1145_s23  }
 0x119 PF: > { %p997_p2 = scmp.ge.s32.totalorder %s1140_s17, 2  ;;  %s723_s26 = sand.u32 1, %s1120_s12  }
 0x11a   : > { %s724_s28 = scalar_lea.sflag [#allocation3], %s723_s26 }
 0x11b   : > { %p994_p3 = pnand %p997_p2, %p1213_p8 }
 0x11d   : > { %1115 = dma.done.wait (!%p994_p3), %s724_s28, 1280  }
 0x11e   : > { %1117 = vsyncadd (!%p994_p3), %s724_s28, 4294966016  ;;  %s16_s17 = sadd.s32 1, %s1140_s17   ;;  %s1416_s12 = smov %s1124_s13 }
 0x11f   : > { %p13_p5 = scmp.ge.s32.totalorder %s16_s17, 4   ;;  %s1417_s13 = smov %s1128_s14 }
 0x120   : > { %s1418_s14 = smov %s1219_s25  ;;  %s1419_s15 = smov %s1136_s16 }
 0x121   : > { %s1420_s16 = smov %s1422_s20  ;;  %15 = sbr.rel (!%p13_p5) target bundleno = 4 (0x4), region = 73 }
 0x128   :  { %729 = vsyncpa [#allocation3], 1 }
 0x129   :  { %731 = vsyncpa [#allocation3 + $0x1], 1 }

</bundles_post_ra>
